<compile_context>
chip_gen: v7x
topology: tpu7x:2x2x1
jax: 0.10.0
libtpu: 0.0.40
codegen_flags: <defaults>
</compile_context>

<pallas_src>
import math

import jax
import jax.numpy as jnp
from jax.experimental import pallas as pl
from jax.experimental.pallas import tpu as pltpu

_EPS = 1e-5
_MAX_FOLD = 16     # cap on the lane-fold factor g


def _cdiv(a, b):
    return (a + b - 1) // b


def _round_down(x, m):
    return (x // m) * m


def _vmem_capacity_bytes():
    try:
        return int(pltpu.get_tpu_info().vmem_capacity_bytes)
    except Exception:
        return 64 << 20            # conservative (v7x-sized) fallback


def _budgets():
    """Per-generation tile / VMEM budgets."""
    vmem = _vmem_capacity_bytes()
    if vmem >= (100 << 20):        # v5e / v6e: 128 MiB VMEM per TensorCore
        return 12 << 20, 96 << 20, 32 << 20   # f32 tile target, vmem limit, cached gate
    else:                          # v7x: 64 MiB VMEM per TensorCore
        return 8 << 20, 48 << 20, 18 << 20


def _fold_factor(n, e):
    """Lane-fold factor g so ef = g*e is a multiple of 128 (lane-dense layout)."""
    if e % 128 == 0:
        return 1
    g = 128 // math.gcd(e, 128)    # == lcm(e,128) // e
    if g > _MAX_FOLD:
        return 1
    if n % g != 0:                 # avoid a full-array pad copy
        return 1
    if n // g < 8:                 # too few folded rows
        return 1
    return g


def _tile_rows(nf, ef, itemsize, target_f32_bytes):
    """Row-tile size: sublane-packing multiple, bounded by an f32 working-set target."""
    rounding = max(8, 32 // itemsize)          # 8 (f32), 16 (bf16), 32 (int8)
    tm = _round_down(max(target_f32_bytes // (ef * 4), rounding), rounding)
    tm = max(tm, rounding)
    if tm >= nf:
        return nf                              # single full-array block (full-dim exception)
    return tm


# ---------------------------------------------------------------------------
# Cached (single-kernel, VMEM-resident) path
# ---------------------------------------------------------------------------

def _make_cached_kernel(*, n_rows, nf, e, g, tm, num_tiles, eps):
    ef = g * e
    inv_n = 1.0 / float(n_rows)
    ragged = (nf % tm) != 0

    def kernel(x_ref, w_ref, b_ref, o_ref, cache_ref, s1_ref, s2_ref, sc_ref, sh_ref):
        p = pl.program_id(0)       # pass: 0 = load+stats, 1 = normalize
        i = pl.program_id(1)       # row tile

        @pl.when((p == 0) & (i == 0))
        def _init():
            s1_ref[...] = jnp.zeros_like(s1_ref)
            s2_ref[...] = jnp.zeros_like(s2_ref)

        @pl.when(p == 0)
        def _load_and_accumulate():
            xv = x_ref[...]
            cache_ref[pl.ds(i * tm, tm), :] = xv
            x = xv.astype(jnp.float32)

            def _acc(xm):
                s1_ref[...] += jnp.sum(xm, axis=0, keepdims=True)
                s2_ref[...] += jnp.sum(xm * xm, axis=0, keepdims=True)

            if ragged:
                @pl.when(i < num_tiles - 1)
                def _full():
                    _acc(x)

                @pl.when(i == num_tiles - 1)
                def _edge():
                    rows = jax.lax.broadcasted_iota(jnp.int32, (tm, 1), 0) + i * tm
                    _acc(jnp.where(rows < nf, x, 0.0))
            else:
                _acc(x)

        @pl.when((p == 1) & (i == 0))
        def _finalize():
            s1 = s1_ref[...]
            s2 = s2_ref[...]
            t1 = s1[:, 0:e]
            t2 = s2[:, 0:e]
            for j in range(1, g):                      # combine lane-fold groups
                t1 = t1 + s1[:, j * e:(j + 1) * e]
                t2 = t2 + s2[:, j * e:(j + 1) * e]
            mean = t1 * inv_n
            var = jnp.maximum(t2 * inv_n - mean * mean, 0.0)   # biased variance (training BN)
            inv_std = jax.lax.rsqrt(var + eps)                 # EUP, effectively free
            scale = w_ref[...].astype(jnp.float32) * inv_std
            shift = b_ref[...].astype(jnp.float32) - mean * scale
            if g > 1:
                scale = jnp.concatenate([scale] * g, axis=-1)
                shift = jnp.concatenate([shift] * g, axis=-1)
            sc_ref[...] = scale
            sh_ref[...] = shift

        @pl.when(p == 1)
        def _normalize():
            xc = cache_ref[pl.ds(i * tm, tm), :].astype(jnp.float32)
            o_ref[...] = (xc * sc_ref[...] + sh_ref[...]).astype(o_ref.dtype)

    return kernel


def _cached_path(x2d, weight, bias, n, e, g, target_tile_bytes, vmem_cap):
    dtype = x2d.dtype
    itemsize = int(jnp.dtype(dtype).itemsize)
    ef = g * e
    nf = n // g
    xf = x2d.reshape(nf, ef)
    w2d = weight.reshape(1, e)
    b2d = bias.reshape(1, e)

    tm = _tile_rows(nf, ef, itemsize, target_tile_bytes)
    num_tiles = _cdiv(nf, tm)
    cache_rows = num_tiles * tm
    tile_hbm = tm * ef * itemsize
    cache_bytes = cache_rows * ef * itemsize
    vmem_limit = int(min(vmem_cap, max(32 << 20, cache_bytes + 4 * tile_hbm + (12 << 20))))

    out_f = pl.pallas_call(
        _make_cached_kernel(n_rows=n, nf=nf, e=e, g=g, tm=tm,
                            num_tiles=num_tiles, eps=_EPS),
        out_shape=jax.ShapeDtypeStruct((nf, ef), dtype),
        grid_spec=pltpu.PrefetchScalarGridSpec(
            num_scalar_prefetch=0,
            grid=(2, num_tiles),
            in_specs=[
                # pass 0 streams tiles; pass 1 keeps the last index -> no re-DMA of x.
                pl.BlockSpec((tm, ef),
                             lambda p, i: ((1 - p) * i + p * (num_tiles - 1), 0)),
                pl.BlockSpec((1, e), lambda p, i: (0, 0)),
                pl.BlockSpec((1, e), lambda p, i: (0, 0)),
            ],
            # pass 0 never changes the output index -> nothing flushed until pass 1.
            out_specs=pl.BlockSpec((tm, ef), lambda p, i: (p * i, 0)),
            scratch_shapes=[
                pltpu.VMEM((cache_rows, ef), dtype),     # whole-activation cache
                pltpu.VMEM((1, ef), jnp.float32),        # sum
                pltpu.VMEM((1, ef), jnp.float32),        # sum of squares
                pltpu.VMEM((1, ef), jnp.float32),        # scale
                pltpu.VMEM((1, ef), jnp.float32),        # shift
            ],
        ),
        compiler_params=pltpu.CompilerParams(
            dimension_semantics=("arbitrary", "arbitrary"),
            vmem_limit_bytes=vmem_limit,
        ),
        cost_estimate=pl.CostEstimate(
            flops=int(5 * n * e),
            transcendentals=int(e),
            bytes_accessed=int(2 * n * e * itemsize + 2 * e * 4),
        ),
    )(xf, w2d, b2d)
    return out_f.reshape(n, e)


# ---------------------------------------------------------------------------
# Tiled (large-activation) path: 2-core stats kernel + parallel normalize kernel
# ---------------------------------------------------------------------------

def _make_stats_kernel(*, nf, tm, tiles_per_core, total_tiles):
    ragged = (nf % tm) != 0
    needs_mask = ragged or (2 * tiles_per_core != total_tiles)

    def kernel(x_ref, s1_ref, s2_ref):
        c = pl.program_id(0)       # TensorCore
        i = pl.program_id(1)       # tile within core

        @pl.when(i == 0)
        def _init():
            s1_ref[...] = jnp.zeros_like(s1_ref)
            s2_ref[...] = jnp.zeros_like(s2_ref)

        t = c * tiles_per_core + i
        x = x_ref[...].astype(jnp.float32)

        def _acc(xm):
            s1_ref[...] += jnp.sum(xm, axis=0, keepdims=True)
            s2_ref[...] += jnp.sum(xm * xm, axis=0, keepdims=True)

        if needs_mask:
            full = (t + 1) * tm <= nf

            @pl.when(full)
            def _full():
                _acc(x)

            @pl.when(jnp.logical_not(full))
            def _partial():
                rows = jax.lax.broadcasted_iota(jnp.int32, (tm, 1), 0) + t * tm
                _acc(jnp.where(rows < nf, x, 0.0))
        else:
            _acc(x)

    return kernel


def _normalize_kernel(x_ref, scale_ref, shift_ref, o_ref):
    x = x_ref[...].astype(jnp.float32)
    o_ref[...] = (x * scale_ref[...] + shift_ref[...]).astype(o_ref.dtype)


def _tiled_path(x2d, weight, bias, n, e, g, target_tile_bytes, vmem_limit):
    dtype = x2d.dtype
    itemsize = int(jnp.dtype(dtype).itemsize)
    ef = g * e
    nf = n // g
    xf = x2d.reshape(nf, ef)

    tm = _tile_rows(nf, ef, itemsize, target_tile_bytes)
    total_tiles = _cdiv(nf, tm)
    tiles_per_core = _cdiv(total_tiles, 2)

    # ---- Phase 1: per-feature sum / sum-of-squares, sharded across both TCs -----
    s1, s2 = pl.pallas_call(
        _make_stats_kernel(nf=nf, tm=tm, tiles_per_core=tiles_per_core,
                           total_tiles=total_tiles),
        out_shape=(jax.ShapeDtypeStruct((2, ef), jnp.float32),
                   jax.ShapeDtypeStruct((2, ef), jnp.float32)),
        grid_spec=pltpu.PrefetchScalarGridSpec(
            num_scalar_prefetch=0,
            grid=(2, tiles_per_core),
            in_specs=[pl.BlockSpec(
                (tm, ef),
                lambda c, i: (jnp.minimum(c * tiles_per_core + i, total_tiles - 1), 0))],
            out_specs=[pl.BlockSpec((1, ef), lambda c, i: (c, 0)),
                       pl.BlockSpec((1, ef), lambda c, i: (c, 0))],
        ),
        compiler_params=pltpu.CompilerParams(
            dimension_semantics=("parallel", "arbitrary"),
            vmem_limit_bytes=vmem_limit,
        ),
        cost_estimate=pl.CostEstimate(
            flops=int(3 * n * e), transcendentals=0,
            bytes_accessed=int(n * e * itemsize + 4 * ef * 4)),
    )(xf)

    # ---- O(E) finalize (tiny; negligible vs. streaming in the large-N regime) ---
    s1c = s1.sum(axis=0).reshape(g, e).sum(axis=0)
    s2c = s2.sum(axis=0).reshape(g, e).sum(axis=0)
    mean = s1c / n
    var = jnp.maximum(s2c / n - mean * mean, 0.0)      # biased variance (training BN)
    inv_std = jax.lax.rsqrt(var + _EPS)
    scale = weight.astype(jnp.float32) * inv_std
    shift = bias.astype(jnp.float32) - mean * scale
    scale_f = jnp.tile(scale, g).reshape(1, ef)
    shift_f = jnp.tile(shift, g).reshape(1, ef)

    # ---- Phase 2: y = x*scale + shift, "parallel" row tiles (megacore split) ----
    out_f = pl.pallas_call(
        _normalize_kernel,
        out_shape=jax.ShapeDtypeStruct((nf, ef), dtype),
        grid_spec=pltpu.PrefetchScalarGridSpec(
            num_scalar_prefetch=0,
            grid=(total_tiles,),
            in_specs=[pl.BlockSpec((tm, ef), lambda i: (i, 0)),
                      pl.BlockSpec((1, ef), lambda i: (0, 0)),
                      pl.BlockSpec((1, ef), lambda i: (0, 0))],
            out_specs=pl.BlockSpec((tm, ef), lambda i: (i, 0)),
        ),
        compiler_params=pltpu.CompilerParams(
            dimension_semantics=("parallel",),
            vmem_limit_bytes=vmem_limit,
        ),
        cost_estimate=pl.CostEstimate(
            flops=int(2 * n * e), transcendentals=0,
            bytes_accessed=int(2 * n * e * itemsize + 2 * ef * 4)),
    )(xf, scale_f, shift_f)

    return out_f.reshape(n, e)


# ---------------------------------------------------------------------------
# Public wrapper
# ---------------------------------------------------------------------------

def normalization_forward(x, weight, bias, *, force_path=None, target_tile_bytes=None):
    """BatchNorm1d-style normalization matching Normalization.forward ('batch' mode).

    x: (..., E) array. weight, bias: (E,) affine params.
    force_path / target_tile_bytes are test knobs ("cached"/"tiled", f32 tile byte budget).
    """
    orig_shape = x.shape
    E = orig_shape[-1]
    N = int(math.prod(orig_shape[:-1]))
    x2d = x.reshape(N, E)
    itemsize = int(jnp.dtype(x.dtype).itemsize)

    target_f32, vmem_limit, cached_max = _budgets()
    big_target = int(target_tile_bytes) if target_tile_bytes is not None else target_f32
    cached_target = min(big_target, 4 << 20)

    g = _fold_factor(N, E)
    nf, ef = N // g, g * E

    use_cached = nf * ef * itemsize <= cached_max
    if force_path == "cached":
        use_cached = True
    elif force_path == "tiled":
        use_cached = False

    if use_cached:
        out2d = _cached_path(x2d, weight, bias, N, E, g, cached_target, vmem_limit)
    else:
        out2d = _tiled_path(x2d, weight, bias, N, E, g, big_target, vmem_limit)
    return out2d.reshape(orig_shape)


# ---------------------------------------------------------------------------
# Self-test
# ---------------------------------------------------------------------------

if __name__ == "__main__":
    key = jax.random.PRNGKey(0)

    def make_inputs(k, B, S, E, dtype=jnp.float32):
        kx, kw, kb = jax.random.split(k, 3)
        x = jax.random.normal(kx, (B, S, E), dtype=jnp.float32).astype(dtype)
        stdv = 1.0 / math.sqrt(E)   # init_parameters: uniform(-1/sqrt(E), 1/sqrt(E))
        w = jax.random.uniform(kw, (E,), minval=-stdv, maxval=stdv, dtype=jnp.float32)
        b = jax.random.uniform(kb, (E,), minval=-stdv, maxval=stdv, dtype=jnp.float32)
        return x, w, b

    def reference(x, w, b):
        B, S, E = x.shape
        x2d = x.reshape(-1, E).astype(jnp.float32)
        mean = x2d.mean(axis=0, keepdims=True)
        var = ((x2d - mean) ** 2).mean(axis=0, keepdims=True)
        return ((x2d - mean) / jnp.sqrt(var + _EPS) * w + b).reshape(B, S, E)

    def check(out, ref, tol, name):
        err = float(jnp.max(jnp.abs(out.astype(jnp.float32) - ref)))
        assert err < tol, f"{name}: max abs err {err} >= {tol}"

    keys = jax.random.split(key, 6)

    # 1) Spec-sized small case (batch=2, seq=8, embed=32): cached path, single block.
    x, w, b = make_inputs(keys[0], 2, 8, 32)
    out = normalization_forward(x, w, b)
    jax.block_until_ready(out)
    check(out, reference(x, w, b), 5e-4, "small")

    # 2) Cached path, lane folding (E=32 -> ef=128), multi-tile + ragged edge.
    x, w, b = make_inputs(keys[1], 4, 500, 32)
    out = normalization_forward(x, w, b, force_path="cached", target_tile_bytes=128 << 10)
    jax.block_until_ready(out)
    check(out, reference(x, w, b), 5e-4, "cached_fold32")

    # 3) Cached path, non-divisor E (160 -> folded ef=640), default tiling.
    x, w, b = make_inputs(keys[2], 2, 1100, 160)
    out = normalization_forward(x, w, b)
    jax.block_until_ready(out)
    check(out, reference(x, w, b), 5e-4, "cached_fold160")

    # 4) Tiled two-kernel path (2-core stats grid), E=32 folded, even tiles.
    x, w, b = make_inputs(keys[3], 8, 2048, 32)
    out = normalization_forward(x, w, b, force_path="tiled", target_tile_bytes=1 << 20)
    jax.block_until_ready(out)
    check(out, reference(x, w, b), 5e-4, "tiled_fold32")

    # 5) Tiled path, E=160 folded, ragged edge + clamped out-of-range core-1 tiles.
    x, w, b = make_inputs(keys[4], 2, 1100, 160)
    out = normalization_forward(x, w, b, force_path="tiled", target_tile_bytes=256 << 10)
    jax.block_until_ready(out)
    check(out, reference(x, w, b), 5e-4, "tiled_fold160")

    # 6) bf16 activations through the cached path (itemsize-aware tiling).
    x, w, b = make_inputs(keys[5], 4, 500, 32, dtype=jnp.bfloat16)
    out = normalization_forward(x, w, b, force_path="cached", target_tile_bytes=64 << 10)
    jax.block_until_ready(out)
    check(out, reference(x.astype(jnp.float32), w, b), 3e-2, "bf16")

    print("KERNEL_OK")
</pallas_src>

<mosaic_0001>
module attributes {stable_mosaic.version = 11 : i64} {
  func.func @kernel(%arg0: i32, %arg1: i32, %arg2: memref<16x32xf32, #tpu.memory_space<vmem>>, %arg3: memref<1x32xf32, #tpu.memory_space<vmem>>, %arg4: memref<1x32xf32, #tpu.memory_space<vmem>>, %arg5: memref<16x32xf32, #tpu.memory_space<vmem>>, %arg6: memref<16x32xf32, #tpu.memory_space<vmem>>, %arg7: memref<1x32xf32, #tpu.memory_space<vmem>>, %arg8: memref<1x32xf32, #tpu.memory_space<vmem>>, %arg9: memref<1x32xf32, #tpu.memory_space<vmem>>, %arg10: memref<1x32xf32, #tpu.memory_space<vmem>>) attributes {dimension_semantics = [#tpu.dimension_semantics<arbitrary>, #tpu.dimension_semantics<arbitrary>], iteration_bounds = array<i64: 2, 1>, scalar_prefetch = 0 : i64, scratch_operands = 5 : i64, tpu.core_type = #tpu.core_type<tc>, window_params = [{transform_indices = @transform_0, window_bounds = array<i64: 16, 32>}, {pipeline_mode = #tpu.pipeline_mode<synchronous>, transform_indices = @transform_1, window_bounds = array<i64: 1, 32>}, {pipeline_mode = #tpu.pipeline_mode<synchronous>, transform_indices = @transform_2, window_bounds = array<i64: 1, 32>}, {transform_indices = @transform_3, window_bounds = array<i64: 16, 32>}]} {
    %c0_i32 = arith.constant 0 : i32
    %0 = arith.cmpi eq, %arg0, %c0_i32 : i32
    %c0_i32_0 = arith.constant 0 : i32
    %1 = arith.cmpi eq, %arg1, %c0_i32_0 : i32
    %2 = arith.andi %0, %1 : i1
    %3 = arith.extui %2 : i1 to i32
    %c0_i32_1 = arith.constant 0 : i32
    %4 = arith.cmpi ne, %3, %c0_i32_1 : i32
    scf.if %4 {
      %cst = arith.constant 0.000000e+00 : f32
      %16 = vector.broadcast %cst : f32 to vector<1x32xf32>
      %c0 = arith.constant 0 : index
      %c0_8 = arith.constant 0 : index
      %17 = vector.load %arg7[%c0, %c0_8] : memref<1x32xf32, #tpu.memory_space<vmem>>, vector<1x32xf32>
      tpu.vector_store %arg7[%c0, %c0_8], %16 {strides = array<i32>} : memref<1x32xf32, #tpu.memory_space<vmem>>, vector<1x32xf32>,
      %cst_9 = arith.constant 0.000000e+00 : f32
      %18 = vector.broadcast %cst_9 : f32 to vector<1x32xf32>
      %c0_10 = arith.constant 0 : index
      %c0_11 = arith.constant 0 : index
      %19 = vector.load %arg8[%c0_10, %c0_11] : memref<1x32xf32, #tpu.memory_space<vmem>>, vector<1x32xf32>
      tpu.vector_store %arg8[%c0_10, %c0_11], %18 {strides = array<i32>} : memref<1x32xf32, #tpu.memory_space<vmem>>, vector<1x32xf32>,
    } else {
    }
    %c0_i32_2 = arith.constant 0 : i32
    %5 = arith.cmpi eq, %arg0, %c0_i32_2 : i32
    %6 = arith.extui %5 : i1 to i32
    %c0_i32_3 = arith.constant 0 : i32
    %7 = arith.cmpi ne, %6, %c0_i32_3 : i32
    scf.if %7 {
      %c0 = arith.constant 0 : index
      %c0_8 = arith.constant 0 : index
      %16 = vector.load %arg2[%c0, %c0_8] : memref<16x32xf32, #tpu.memory_space<vmem>>, vector<16x32xf32>
      %c16_i32 = arith.constant 16 : i32
      %17 = arith.muli %arg1, %c16_i32 : i32
      %18 = arith.index_cast %17 : i32 to index
      %c0_9 = arith.constant 0 : index
      %19 = vector.load %arg6[%18, %c0_9] : memref<16x32xf32, #tpu.memory_space<vmem>>, vector<16x32xf32>
      tpu.vector_store %arg6[%18, %c0_9], %16 {strides = array<i32>} : memref<16x32xf32, #tpu.memory_space<vmem>>, vector<16x32xf32>,
      %c0_10 = arith.constant 0 : index
      %c0_11 = arith.constant 0 : index
      %20 = vector.load %arg7[%c0_10, %c0_11] : memref<1x32xf32, #tpu.memory_space<vmem>>, vector<1x32xf32>
      %cst = arith.constant dense<0.000000e+00> : vector<32xf32>
      %21 = vector.multi_reduction <add>, %16, %cst [0] : vector<16x32xf32> to vector<32xf32>
      %22 = vector.shape_cast %21 : vector<32xf32> to vector<1x32xf32>
      %23 = arith.addf %20, %22 : vector<1x32xf32>
      %c0_12 = arith.constant 0 : index
      %c0_13 = arith.constant 0 : index
      %24 = vector.load %arg7[%c0_12, %c0_13] : memref<1x32xf32, #tpu.memory_space<vmem>>, vector<1x32xf32>
      tpu.vector_store %arg7[%c0_12, %c0_13], %23 {strides = array<i32>} : memref<1x32xf32, #tpu.memory_space<vmem>>, vector<1x32xf32>,
      %c0_14 = arith.constant 0 : index
      %c0_15 = arith.constant 0 : index
      %25 = vector.load %arg8[%c0_14, %c0_15] : memref<1x32xf32, #tpu.memory_space<vmem>>, vector<1x32xf32>
      %26 = arith.mulf %16, %16 : vector<16x32xf32>
      %cst_16 = arith.constant dense<0.000000e+00> : vector<32xf32>
      %27 = vector.multi_reduction <add>, %26, %cst_16 [0] : vector<16x32xf32> to vector<32xf32>
      %28 = vector.shape_cast %27 : vector<32xf32> to vector<1x32xf32>
      %29 = arith.addf %25, %28 : vector<1x32xf32>
      %c0_17 = arith.constant 0 : index
      %c0_18 = arith.constant 0 : index
      %30 = vector.load %arg8[%c0_17, %c0_18] : memref<1x32xf32, #tpu.memory_space<vmem>>, vector<1x32xf32>
      tpu.vector_store %arg8[%c0_17, %c0_18], %29 {strides = array<i32>} : memref<1x32xf32, #tpu.memory_space<vmem>>, vector<1x32xf32>,
    } else {
    }
    %c1_i32 = arith.constant 1 : i32
    %8 = arith.cmpi eq, %arg0, %c1_i32 : i32
    %c0_i32_4 = arith.constant 0 : i32
    %9 = arith.cmpi eq, %arg1, %c0_i32_4 : i32
    %10 = arith.andi %8, %9 : i1
    %11 = arith.extui %10 : i1 to i32
    %c0_i32_5 = arith.constant 0 : i32
    %12 = arith.cmpi ne, %11, %c0_i32_5 : i32
    scf.if %12 {
      %c0 = arith.constant 0 : index
      %c0_8 = arith.constant 0 : index
      %16 = vector.load %arg7[%c0, %c0_8] : memref<1x32xf32, #tpu.memory_space<vmem>>, vector<1x32xf32>
      %c0_9 = arith.constant 0 : index
      %c0_10 = arith.constant 0 : index
      %17 = vector.load %arg8[%c0_9, %c0_10] : memref<1x32xf32, #tpu.memory_space<vmem>>, vector<1x32xf32>
      %cst = arith.constant 6.250000e-02 : f32
      %18 = vector.broadcast %cst : f32 to vector<1x32xf32>
      %19 = arith.mulf %16, %18 : vector<1x32xf32>
      %cst_11 = arith.constant 6.250000e-02 : f32
      %20 = vector.broadcast %cst_11 : f32 to vector<1x32xf32>
      %21 = arith.mulf %17, %20 : vector<1x32xf32>
      %22 = arith.mulf %19, %19 : vector<1x32xf32>
      %23 = arith.subf %21, %22 : vector<1x32xf32>
      %cst_12 = arith.constant 0.000000e+00 : f32
      %24 = vector.broadcast %cst_12 : f32 to vector<1x32xf32>
      %25 = arith.maximumf %23, %24 : vector<1x32xf32>
      %cst_13 = arith.constant 9.99999974E-6 : f32
      %26 = vector.broadcast %cst_13 : f32 to vector<1x32xf32>
      %27 = arith.addf %25, %26 : vector<1x32xf32>
      %28 = math.rsqrt %27 : vector<1x32xf32>
      %c0_14 = arith.constant 0 : index
      %c0_15 = arith.constant 0 : index
      %29 = vector.load %arg3[%c0_14, %c0_15] : memref<1x32xf32, #tpu.memory_space<vmem>>, vector<1x32xf32>
      %30 = arith.mulf %29, %28 : vector<1x32xf32>
      %c0_16 = arith.constant 0 : index
      %c0_17 = arith.constant 0 : index
      %31 = vector.load %arg4[%c0_16, %c0_17] : memref<1x32xf32, #tpu.memory_space<vmem>>, vector<1x32xf32>
      %32 = arith.mulf %19, %30 : vector<1x32xf32>
      %33 = arith.subf %31, %32 : vector<1x32xf32>
      %c0_18 = arith.constant 0 : index
      %c0_19 = arith.constant 0 : index
      %34 = vector.load %arg9[%c0_18, %c0_19] : memref<1x32xf32, #tpu.memory_space<vmem>>, vector<1x32xf32>
      tpu.vector_store %arg9[%c0_18, %c0_19], %30 {strides = array<i32>} : memref<1x32xf32, #tpu.memory_space<vmem>>, vector<1x32xf32>,
      %c0_20 = arith.constant 0 : index
      %c0_21 = arith.constant 0 : index
      %35 = vector.load %arg10[%c0_20, %c0_21] : memref<1x32xf32, #tpu.memory_space<vmem>>, vector<1x32xf32>
      tpu.vector_store %arg10[%c0_20, %c0_21], %33 {strides = array<i32>} : memref<1x32xf32, #tpu.memory_space<vmem>>, vector<1x32xf32>,
    } else {
    }
    %c1_i32_6 = arith.constant 1 : i32
    %13 = arith.cmpi eq, %arg0, %c1_i32_6 : i32
    %14 = arith.extui %13 : i1 to i32
    %c0_i32_7 = arith.constant 0 : i32
    %15 = arith.cmpi ne, %14, %c0_i32_7 : i32
    scf.if %15 {
      %c16_i32 = arith.constant 16 : i32
      %16 = arith.muli %arg1, %c16_i32 : i32
      %17 = arith.index_cast %16 : i32 to index
      %c0 = arith.constant 0 : index
      %18 = vector.load %arg6[%17, %c0] : memref<16x32xf32, #tpu.memory_space<vmem>>, vector<16x32xf32>
      %c0_8 = arith.constant 0 : index
      %c0_9 = arith.constant 0 : index
      %19 = vector.load %arg9[%c0_8, %c0_9] : memref<1x32xf32, #tpu.memory_space<vmem>>, vector<1x32xf32>
      %20 = vector.broadcast %19 : vector<1x32xf32> to vector<16x32xf32>
      %21 = arith.mulf %18, %20 : vector<16x32xf32>
      %c0_10 = arith.constant 0 : index
      %c0_11 = arith.constant 0 : index
      %22 = vector.load %arg10[%c0_10, %c0_11] : memref<1x32xf32, #tpu.memory_space<vmem>>, vector<1x32xf32>
      %23 = vector.broadcast %22 : vector<1x32xf32> to vector<16x32xf32>
      %24 = arith.addf %21, %23 : vector<16x32xf32>
      %c0_12 = arith.constant 0 : index
      %c0_13 = arith.constant 0 : index
      %25 = vector.load %arg5[%c0_12, %c0_13] : memref<16x32xf32, #tpu.memory_space<vmem>>, vector<16x32xf32>
      tpu.vector_store %arg5[%c0_12, %c0_13], %24 {strides = array<i32>} : memref<16x32xf32, #tpu.memory_space<vmem>>, vector<16x32xf32>,
    } else {
    }
    return
  }
  func.func @transform_0(%arg0: i32, %arg1: i32) -> (i32, i32) {
    %c1_i32 = arith.constant 1 : i32
    %0 = arith.subi %c1_i32, %arg0 : i32
    %1 = arith.muli %0, %arg1 : i32
    %c0_i32 = arith.constant 0 : i32
    %2 = arith.muli %arg0, %c0_i32 : i32
    %3 = arith.addi %1, %2 : i32
    %c0_i32_0 = arith.constant 0 : i32
    %c0_i32_1 = arith.constant 0 : i32
    return %3, %c0_i32_0 : i32, i32
  }
  func.func @transform_1(%arg0: i32, %arg1: i32) -> (i32, i32) {
    %c0_i32 = arith.constant 0 : i32
    %c0_i32_0 = arith.constant 0 : i32
    %c0_i32_1 = arith.constant 0 : i32
    return %c0_i32, %c0_i32_0 : i32, i32
  }
  func.func @transform_2(%arg0: i32, %arg1: i32) -> (i32, i32) {
    %c0_i32 = arith.constant 0 : i32
    %c0_i32_0 = arith.constant 0 : i32
    %c0_i32_1 = arith.constant 0 : i32
    return %c0_i32, %c0_i32_0 : i32, i32
  }
  func.func @transform_3(%arg0: i32, %arg1: i32) -> (i32, i32) {
    %0 = arith.muli %arg0, %arg1 : i32
    %c0_i32 = arith.constant 0 : i32
    %c0_i32_0 = arith.constant 0 : i32
    return %0, %c0_i32 : i32, i32
  }
}

</mosaic_0001>

<bundles_post_ra>
// kernel: tpu_custom_call.1
= control target key start
LH: loop header
LB: loop body
LE: loop exit
PB: predicated region body
PF: predicated region fallthrough
CT: control target
= control target key end

     0   :  { %8 = vsyncpa [#allocation8], 0  ;;  %s693_s0 = inlined_call_operand.hbm [shape: f32[16,32], index: 0, kind: input, shape index: {}]   ;;  %s694_s1 = inlined_call_operand.vmem [shape: f32[1,32], index: 1, kind: input, shape index: {}]   ;;  %s695_s2 = inlined_call_operand.vmem [shape: f32[1,32], index: 2, kind: input, shape index: {}]   ;;  %s696_s3 = inlined_call_operand.hbm [shape: f32[16,32], index: 3, kind: output, shape index: {}]  }
   0x1   :  { %10 = vsyncpa [#allocation8 + $0x1], 0 }
   0x2   :  { %11 = vsyncpa [#allocation9], 0 }
   0x3   :  { %13 = vsyncpa [#allocation9 + $0x1], 0  ;;  %s597_s12 = smov 0   ;;  %s599_s13 = smov 0  }
   0x4   :  { %s601_s14 = smov 0  }
   0x5 LB: > { %s410_s15 = sadd.s32 4294967295, %s568_s14   ;;  %s411_s16 = sadd.s32 4294967294, %s568_s14   ;;  %s568_s14 = sphi %s601_s14, %s19_s14   ;;  %s564_s13 = sphi %s599_s13, %s702_s13   ;;  %s560_s12 = sphi %s597_s12, %s701_s12  }
   0x6   : > { %s31_s17 = sadd.s32 1, %s564_s13  ;;  %p445_p2 = scmp.lt.s32.totalorder %s568_s14, 2 }
   0x7   : > { %p33_p1 = scmp.ge.s32.totalorder %s31_s17, 2  ;;  %p446_p3 = scmp.eq.s32.totalorder %s568_s14, 0 }
   0x8   : > { %s570_s19 = smov [#allocation7]   ;;  %s484_s23 = scalar_lea.hbm %s693_s0, 256 }
   0x9   : > { %s704_s17 = smov (%p33_p1, %s31_s17), 0  ;;  %p620_p4 = pnand %p446_p3, %p445_p2 }
   0xa   : > { %s168_s20 = sshll.u32 %s570_s19, 4  ;;  %p485_p6 = scmp.ne.s32.totalorder %s693_s0, %s484_s23  ;;  %s169_s20 = int_to_ptr.vmem [resolvable:$true] %s168_s20 }
   0xb   : > { %p486_p7 = pneg %p620_p4  ;;  %p491_p10 = scmp.lt.u32.totalorder %s484_s23, %s693_s0 }
   0xd   : > { %p487_p8 = pnand %p486_p7, %p485_p6 }
   0xf   : > { %p488_p9 = pneg %p487_p8 }
  0x11   : > { %p493_p11 = pnand %p491_p10, %p488_p9 }
  0x13   : > { %496 = shalt.err (!%p493_p11)
}
  0x14   : > { %s497_s28 = scalar_lea.vmem %s169_s20, 256  ;;  %s504_s29 = scalar_lea.vmem %s169_s20, 512 }
  0x15   : > { %p498_p12 = scmp.ne.s32.totalorder %s169_s20, %s497_s28  ;;  %p505_p2 = scmp.lt.s32.totalorder %s169_s20, %s169_s20 }
  0x16   : > { %p506_p3 = scmp.lt.s32.totalorder %s504_s29, %s497_s28 }
  0x17   : > { %p500_p13 = pnand %p498_p12, %p486_p7 }
  0x18   : > { %p507_p0 = por %p506_p3, %p505_p2 }
  0x19   : > { %p501_p1 = pneg %p500_p13 }
  0x1b   : > { %p508_p5 = pnand %p507_p0, %p501_p1 }
  0x1d   : > { %511 = shalt.err (!%p508_p5)
}
  0x1e   : > { %s571_s30 = smov 128   ;;  %s572_s4 = smov 8  }
  0x1f   : > { %440 = dma.hbm_to_vmem [thread:$0]  (!%p620_p4), %s693_s0, 256, %s169_s20, [#allocation8], %s571_s30, %s571_s30, %s572_s4  }
  0x20   : > { %p176_p6 = scmp.lt.s32.totalorder %s568_s14, 3  ;;  %p698_p8 = scmp.ge.s32.totalorder %s568_s14, 1 }
  0x22   : > { %p177_p7 = pnand %p698_p8, %p176_p6 }
  0x23   : > { %p447_p9 = scmp.eq.s32.totalorder (!%p177_p7), %s410_s15, 0 }
  0x24   : > { %180 = sbr.rel (%p177_p7) target bundleno = 142 (0x8e), region = 32 }
  0x2b   : > { %551 = dma.done.wait (%p447_p9), [#allocation8], 256  }
  0x2c   : > { %553 = vsyncadd (%p447_p9), [#allocation8], 4294967040  ;;  %p214_p0 = scmp.eq.s32.totalorder %s560_s12, 0 }
  0x2d   : > { %vm220_vm0 = vcmask (%p214_p0), 253952   ;;  %v573_v0 = vmov (%p214_p0), 0.0  }
  0x2e   : > { %219 = sbr.rel (!%p214_p0) target bundleno = 53 (0x35), region = 40  ;;  %221 = vst.msk [vmem:[#allocation3] sm:$0x1] (%p214_p0), %vm220_vm0, %v573_v0  ;;  %222 = vst.msk [vmem:[#allocation4] sm:$0x1] (%p214_p0), %vm220_vm0, %v573_v0 }
  0x35 PF: > { %p418_p5 = scmp.ne.s32.totalorder %s560_s12, 0 }
  0x36   : > { %v226_v1 = vld [vmem:[#allocation7] sm:$0xff] (!%p418_p5)  ;;  %vm230_vm1 = vcmask (!%p418_p5), 261120   ;;  %v227_v2 = vld [vmem:[#allocation7 + $0x8] sm:$0xff] (!%p418_p5)  ;;  %v233_v20 = vld [vmem:[#allocation3] sm:$0x1] (!%p418_p5)  ;;  %vm244_vm2 = vcmask (!%p418_p5), 253952  }
  0x37   : > { %225 = sbr.rel (%p418_p5) target bundleno = 75 (0x4b), region = 44  ;;  %231 = vst.msk [vmem:[#allocation2] sm:$0xff] (!%p418_p5), %vm230_vm1, %v226_v1  ;;  %v234_v3 = vsel (!%p418_p5), %vm230_vm1, %v226_v1, 0.0  ;;  %v247_v4 = vmul.f32 (!%p418_p5), %v226_v1, %v226_v1  ;;  %232 = vst.msk [vmem:[#allocation2 + $0x8] sm:$0xff] (!%p418_p5), %vm230_vm1, %v227_v2  ;;  %v235_v5 = vsel (!%p418_p5), %vm230_vm1, %v227_v2, 0.0  ;;  %v248_v6 = vmul.f32 (!%p418_p5), %v227_v2, %v227_v2 }
  0x38   : > { %v236_v7 = vadd.f32 (!%p418_p5), %v235_v5, %v234_v3  ;;  %v246_v23 = vld [vmem:[#allocation4] sm:$0x1] (!%p418_p5) }
  0x39   : > { %v249_v8 = vsel (!%p418_p5), %vm230_vm1, %v247_v4, 0.0  ;;  %v250_v9 = vsel (!%p418_p5), %vm230_vm1, %v248_v6, 0.0 }
  0x3a   : > { %v237_v10 = vrot.slane (!%p418_p5), %v236_v7, 4  ;;  %v251_v11 = vadd.f32 (!%p418_p5), %v250_v9, %v249_v8 }
  0x3c   : > { %v238_v12 = vadd.f32 (!%p418_p5), %v237_v10, %v236_v7  ;;  %v252_v13 = vrot.slane (!%p418_p5), %v251_v11, 4 }
  0x3e   : > { %v239_v14 = vrot.slane %v238_v12, 2  ;;  %v253_v15 = vadd.f32 %v252_v13, %v251_v11 }
  0x40   : > { %v240_v16 = vadd.f32 %v239_v14, %v238_v12  ;;  %v254_v17 = vrot.slane %v253_v15, 2 }
  0x42   : > { %v241_v18 = vrot.slane %v240_v16, 1  ;;  %v255_v19 = vadd.f32 %v254_v17, %v253_v15 }
  0x44   : > { %v242_v21 = vadd.f32 %v241_v18, %v240_v16  ;;  %v256_v22 = vrot.slane %v255_v19, 1 }
  0x46   : > { %v243_v24 = vadd.f32 %v242_v21, %v233_v20  ;;  %v257_v25 = vadd.f32 %v256_v22, %v255_v19 }
  0x48   : > { %245 = vst.msk [vmem:[#allocation3] sm:$0x1] %vm244_vm2, %v243_v24  ;;  %v258_v26 = vadd.f32 %v257_v25, %v246_v23 }
  0x4a   : > { %259 = vst.msk [vmem:[#allocation4] sm:$0x1] %vm244_vm2, %v258_v26 }
  0x4b PF: > { %p260_p4 = scmp.eq.s32.totalorder %s560_s12, 1 }
  0x4c   : > { %v274_v35 = vld [vmem:[%s694_s1] sm:$0x1] (%p260_p4)  ;;  %vm279_vm3 = vcmask (%p260_p4), 253952  }
  0x4d   : > { %264 = sbr.rel (!%p260_p4) target bundleno = 108 (0x6c), region = 48  ;;  %v276_v38 = vld [vmem:[%s695_s2] sm:$0x1] (%p260_p4) }
  0x4f   : > { %v265_v27 = vld [vmem:[#allocation3] sm:$0x1] (%p260_p4) }
  0x50   : > { %v267_v29 = vmul.f32 (%p260_p4), 0.0625, %v265_v27 }
  0x51   : > { %v266_v28 = vld [vmem:[#allocation4] sm:$0x1] (%p260_p4) }
  0x52   : > { %v268_v30 = vmul.f32 (%p260_p4), 0.0625, %v266_v28  ;;  %v269_v31 = vmul.f32 (%p260_p4), %v267_v29, %v267_v29 }
  0x54   : > { %v270_v32 = vsub.f32 %v268_v30, %v269_v31 }
  0x56   : > { %v271_v33 = vmax.f32 %v270_v32, 0.0 }
  0x58   : > { %v272_v34 = vadd.f32 1e-05, %v271_v33 }
  0x5a   : > { %482 = vrsqrt.f32 %v272_v34 }
  0x64   : > { %v483_v36 = vpop.eup %482 }
  0x65   : > { %v275_v37 = vmul.f32 %v483_v36, %v274_v35 }
  0x67   : > { %280 = vst.msk [vmem:[#allocation5] sm:$0x1] %vm279_vm3, %v275_v37  ;;  %v277_v39 = vmul.f32 %v275_v37, %v267_v29 }
  0x69   : > { %v278_v40 = vsub.f32 %v276_v38, %v277_v39 }
  0x6b   : > { %281 = vst.msk [vmem:[#allocation6] sm:$0x1] %vm279_vm3, %v278_v40 }
  0x6c PF: > { %p420_p10 = scmp.ne.s32.totalorder %s560_s12, 1 }
  0x6d   : > { %v287_v41 = vld [vmem:[#allocation2] sm:$0xff] (!%p420_p10)  ;;  %v288_v45 = vld [vmem:[#allocation2 + $0x8] sm:$0xff] (!%p420_p10)  ;;  %vm307_vm4 = vcmask (!%p420_p10), 261120  }
  0x6e   : > { %284 = sbr.rel (%p420_p10) target bundleno = 118 (0x76), region = 52  ;;  %v421_v42 = vld [vmem:[#allocation5] ss:$0 sm:$0xff] (!%p420_p10) }
  0x6f   : > { %v296_v44 = vmul.f32 (!%p420_p10), %v421_v42, %v287_v41  ;;  %v297_v46 = vmul.f32 (!%p420_p10), %v421_v42, %v288_v45 }
  0x72   : > { %v422_v43 = vld [vmem:[#allocation6] ss:$0 sm:$0xff] (!%p420_p10) }
  0x73   : > { %v305_v47 = vadd.f32 (!%p420_p10), %v422_v43, %v296_v44  ;;  %v306_v48 = vadd.f32 (!%p420_p10), %v422_v43, %v297_v46 }
  0x75   : > { %308 = vst.msk [vmem:[#allocation10] sm:$0xff] %vm307_vm4, %v305_v47  ;;  %309 = vst.msk [vmem:[#allocation10 + $0x8] sm:$0xff] %vm307_vm4, %v306_v48 }
  0x76 PF: > { %p658_p11 = scmp.eq.s32.totalorder %s410_s15, 1  ;;  %s574_s12 = smov [#allocation10]  }
  0x77   : > { %s325_s18 = sshll.u32 %s574_s12, 4  ;;  %s326_s18 = int_to_ptr.vmem [resolvable:$true] %s325_s18 }
  0x78   : > { %s512_s19 = scalar_lea.vmem %s326_s18, 256  ;;  %s518_s20 = scalar_lea.vmem %s326_s18, 512 }
  0x79   : > { %p513_p12 = scmp.ne.s32.totalorder %s326_s18, %s512_s19  ;;  %p519_p2 = scmp.lt.s32.totalorder %s326_s18, %s326_s18 }
  0x7a   : > { %p520_p3 = scmp.lt.s32.totalorder %s518_s20, %s512_s19 }
  0x7b   : > { %p514_p13 = pnand %p513_p12, %p658_p11 }
  0x7c   : > { %p521_p6 = por %p520_p3, %p519_p2 }
  0x7d   : > { %p515_p1 = pneg %p514_p13 }
  0x7f   : > { %p522_p8 = pnand %p521_p6, %p515_p1 }
  0x81   : > { %525 = shalt.err (!%p522_p8)
}
  0x82   : > { %s526_s22 = scalar_lea.hbm %s696_s3, 256 }
  0x83   : > { %p527_p7 = scmp.ne.s32.totalorder %s696_s3, %s526_s22  ;;  %p532_p5 = scmp.lt.u32.totalorder %s526_s22, %s696_s3 }
  0x85   : > { %p528_p9 = pnand %p527_p7, %p658_p11 }
  0x87   : > { %p529_p0 = pneg %p528_p9 }
  0x89   : > { %p534_p4 = pnand %p532_p5, %p529_p0 }
  0x8b   : > { %537 = shalt.err (!%p534_p4)
}
  0x8c   : > { %s575_s27 = smov 128   ;;  %s576_s28 = smov 8  }
  0x8d   : > { %434 = dma.vmem_to_hbm [thread:$0]  (%p658_p11), %s326_s18, 256, %s696_s3, [#allocation9], %s575_s27, %s575_s27, %s576_s28  }
  0x8e PF: > { %p450_p10 = scmp.eq.s32.totalorder %s411_s16, 1  ;;  %p700_p12 = scmp.ge.s32.totalorder %s568_s14, 2 }
  0x90   : > { %p442_p13 = pnand %p450_p10, %p700_p12 }
  0x92   : > { %555 = dma.done.wait (!%p442_p13), [#allocation9], 256  }
  0x93   : > { %557 = vsyncadd (!%p442_p13), [#allocation9], 4294967040  ;;  %s19_s14 = sadd.s32 1, %s568_s14   ;;  %s701_s12 = smov %s564_s13 }
  0x94   : > { %p16_p1 = scmp.ge.s32.totalorder %s19_s14, 4   ;;  %s702_s13 = smov %s704_s17 }
  0x96   :  { %18 = sbr.rel (!%p16_p1) target bundleno = 5 (0x5), region = 95 }
  0x9d   :  { %346 = vsyncpa [#allocation8], 1 }
  0x9e   :  { %348 = vsyncpa [#allocation8 + $0x1], 1 }
  0x9f   :  { %349 = vsyncpa [#allocation9], 1 }
  0xa0   :  { %351 = vsyncpa [#allocation9 + $0x1], 1 }

</bundles_post_ra>
